<compile_context>
chip_gen: v7x
topology: tpu7x:2x2x1
jax: 0.10.0
libtpu: 0.0.40
codegen_flags: <defaults>
</compile_context>

<pallas_src>
import jax
import jax.numpy as jnp
from jax.experimental import pallas as pl
from jax.experimental.pallas import tpu as pltpu

_LANES = 128
_TARGET_TILE_BYTES = 2 * 1024 * 1024      # per-block bytes (input side)
_VMEM_LIMIT_CAP = 32 * 1024 * 1024        # never request more scoped VMEM
_VMEM_LIMIT_FLOOR = 16 * 1024 * 1024


def _make_swish_kernel(compute_dtype):
    def kernel(x_ref, o_ref):
        xc = x_ref[...].astype(compute_dtype)
        # sigmoid(x) = 0.5 * (tanh(0.5 * x) + 1): one EUP op per element
        # (no exp + exact-divide expansion).
        sig = 0.5 * (jnp.tanh(0.5 * xc) + 1.0)
        o_ref[...] = (xc * sig).astype(o_ref.dtype)
    return kernel


def _bf16_eup_available():
    """bf16 VPU/EUP exists on v6e (Trillium) and v7x; not on v2-v5."""
    try:
        kind = jax.devices()[0].device_kind.lower()
    except Exception:
        return False
    if any(old in kind for old in ("v2", "v3", "v4", "v5")):
        return False
    return ("v6" in kind) or ("v7" in kind) or ("trillium" in kind)


def _compute_dtype_for(dtype):
    if dtype == jnp.bfloat16 and _bf16_eup_available():
        return jnp.bfloat16
    return jnp.float32


def _sublane_for(dtype):
    """Sublane packing granularity: 8 for 32-bit, 16 for bf16, 32 for 8-bit."""
    itemsize = jnp.dtype(dtype).itemsize
    return max(8, 32 // max(1, itemsize))


def _pick_cols(n):
    """Widest lane-dense column count (multiple of 128) that divides n."""
    for c in (4096, 2048, 1024, 512, 256, 128):
        if n % c == 0:
            return c
    return None  # ragged size -> 1-D path


def _vmem_limit(block_bytes):
    # ~2x the double-buffered in+out working set, floored/capped to be safe
    # on every generation (v5e/v6e default scoped limits, v7x 64 MiB VMEM).
    return int(min(_VMEM_LIMIT_CAP, max(_VMEM_LIMIT_FLOOR, 8 * block_bytes)))


def _choose_block_rows(rows, cols, itemsize, sublane):
    bytes_per_row = cols * itemsize
    target = max(1, _TARGET_TILE_BYTES // bytes_per_row)
    if target >= rows:
        block = rows                                   # full extent: always legal
    else:
        block = max(sublane, (target // sublane) * sublane)
    # Megacore balance (v7x shards the "parallel" axis across 2 TCs): when the
    # array is big enough to split, prefer an even grid >= 2.
    if rows >= 2 * sublane:
        grid = pl.cdiv(rows, block)
        if grid == 1:
            grid = 2
        elif grid % 2 == 1:
            grid += 1
        block = pl.cdiv(rows, grid)
        block = min(rows, ((block + sublane - 1) // sublane) * sublane)
    return block


def _swish_2d(x2d, compute_dtype):
    rows, cols = x2d.shape
    itemsize = jnp.dtype(x2d.dtype).itemsize
    sublane = _sublane_for(x2d.dtype)
    block_rows = _choose_block_rows(rows, cols, itemsize, sublane)
    grid = (pl.cdiv(rows, block_rows),)                # ragged last block masked
    return pl.pallas_call(
        _make_swish_kernel(compute_dtype),
        out_shape=jax.ShapeDtypeStruct(x2d.shape, x2d.dtype),
        grid_spec=pltpu.PrefetchScalarGridSpec(
            num_scalar_prefetch=0,
            grid=grid,
            in_specs=[pl.BlockSpec((block_rows, cols), lambda i: (i, 0))],
            out_specs=pl.BlockSpec((block_rows, cols), lambda i: (i, 0)),
        ),
        compiler_params=pltpu.CompilerParams(
            dimension_semantics=("parallel",),
            vmem_limit_bytes=_vmem_limit(block_rows * cols * itemsize),
        ),
    )(x2d)


def _swish_1d(x_flat, compute_dtype):
    """Ragged-size path: grid straight over the unpadded flat array."""
    n = x_flat.shape[0]
    itemsize = jnp.dtype(x_flat.dtype).itemsize
    block = max(_LANES, (_TARGET_TILE_BYTES // itemsize // _LANES) * _LANES)
    if block >= n:
        block = n                      # full-extent block: legal for ragged n
    grid = (pl.cdiv(n, block),)        # ragged last block is masked by Pallas
    return pl.pallas_call(
        _make_swish_kernel(compute_dtype),
        out_shape=jax.ShapeDtypeStruct((n,), x_flat.dtype),
        grid_spec=pltpu.PrefetchScalarGridSpec(
            num_scalar_prefetch=0,
            grid=grid,
            in_specs=[pl.BlockSpec((block,), lambda i: (i,))],
            out_specs=pl.BlockSpec((block,), lambda i: (i,)),
        ),
        compiler_params=pltpu.CompilerParams(
            dimension_semantics=("parallel",),
            vmem_limit_bytes=_vmem_limit(block * itemsize),
        ),
    )(x_flat)


def swish(x):
    """Elementwise swish/SiLU: x * sigmoid(x), for floating-point arrays."""
    if not jnp.issubdtype(x.dtype, jnp.floating):
        raise TypeError(f"swish expects a floating dtype, got {x.dtype}")

    orig_shape = x.shape
    n = x.size
    if n == 0:
        return x

    compute_dtype = _compute_dtype_for(x.dtype)
    x_flat = x.reshape(-1)

    cols = _pick_cols(n)
    if cols is None:
        out = _swish_1d(x_flat, compute_dtype)
    else:
        out = _swish_2d(x_flat.reshape(n // cols, cols), compute_dtype)
    return out.reshape(orig_shape)


if __name__ == "__main__":
    key = jax.random.PRNGKey(0)
    x = jax.random.normal(key, (2, 4, 16, 16), dtype=jnp.float32)  # NCHW

    y = swish(x)
    jax.block_until_ready(y)

    y_ref = x * jax.nn.sigmoid(x)
    assert y.shape == x.shape and y.dtype == x.dtype
    assert jnp.allclose(y, y_ref, atol=1e-5, rtol=1e-5)

    # Exercise the ragged (non-multiple-of-128) path: no pad/slice involved.
    x2 = jax.random.normal(jax.random.PRNGKey(0), (3, 5, 7), dtype=jnp.float32)
    y2 = swish(x2)
    jax.block_until_ready(y2)
    assert jnp.allclose(y2, x2 * jax.nn.sigmoid(x2), atol=1e-5, rtol=1e-5)

    print("KERNEL_OK")
</pallas_src>

<mosaic_0001>
module attributes {stable_mosaic.version = 11 : i64} {
  func.func @kernel(%arg0: i32, %arg1: memref<1x2048xf32, #tpu.memory_space<vmem>>, %arg2: memref<1x2048xf32, #tpu.memory_space<vmem>>) attributes {dimension_semantics = [#tpu.dimension_semantics<parallel>], iteration_bounds = array<i64: 1>, scalar_prefetch = 0 : i64, scratch_operands = 0 : i64, tpu.core_type = #tpu.core_type<tc>, window_params = [{transform_indices = @transform_0, window_bounds = array<i64: 1, 2048>}, {transform_indices = @transform_1, window_bounds = array<i64: 1, 2048>}]} {
    %c0 = arith.constant 0 : index
    %c0_0 = arith.constant 0 : index
    %0 = vector.load %arg1[%c0, %c0_0] : memref<1x2048xf32, #tpu.memory_space<vmem>>, vector<1x2048xf32>
    %cst = arith.constant 5.000000e-01 : f32
    %1 = vector.broadcast %cst : f32 to vector<1x2048xf32>
    %2 = arith.mulf %1, %0 : vector<1x2048xf32>
    %3 = math.tanh %2 : vector<1x2048xf32>
    %cst_1 = arith.constant 1.000000e+00 : f32
    %4 = vector.broadcast %cst_1 : f32 to vector<1x2048xf32>
    %5 = arith.addf %3, %4 : vector<1x2048xf32>
    %cst_2 = arith.constant 5.000000e-01 : f32
    %6 = vector.broadcast %cst_2 : f32 to vector<1x2048xf32>
    %7 = arith.mulf %6, %5 : vector<1x2048xf32>
    %8 = arith.mulf %0, %7 : vector<1x2048xf32>
    %c0_3 = arith.constant 0 : index
    %c0_4 = arith.constant 0 : index
    %9 = vector.load %arg2[%c0_3, %c0_4] : memref<1x2048xf32, #tpu.memory_space<vmem>>, vector<1x2048xf32>
    tpu.vector_store %arg2[%c0_3, %c0_4], %8 {strides = array<i32>} : memref<1x2048xf32, #tpu.memory_space<vmem>>, vector<1x2048xf32>,
    return
  }
  func.func @transform_0(%arg0: i32) -> (i32, i32) {
    %c0_i32 = arith.constant 0 : i32
    %c0_i32_0 = arith.constant 0 : i32
    return %arg0, %c0_i32 : i32, i32
  }
  func.func @transform_1(%arg0: i32) -> (i32, i32) {
    %c0_i32 = arith.constant 0 : i32
    %c0_i32_0 = arith.constant 0 : i32
    return %arg0, %c0_i32 : i32, i32
  }
}

</mosaic_0001>

<bundles_post_ra>
// kernel: tpu_custom_call.1
= control target key start
LH: loop header
LB: loop body
LE: loop exit
PB: predicated region body
PF: predicated region fallthrough
CT: control target
= control target key end

     0   :  { %6 = vsyncpa [#allocation3], 0  ;;  %s140_s0 = inlined_call_operand.hbm [shape: f32[1,2048], index: 0, kind: input, shape index: {}]   ;;  %s141_s1 = inlined_call_operand.hbm [shape: f32[1,2048], index: 1, kind: output, shape index: {}]  }
   0x1   :  { %7 = vsyncpa [#allocation4], 0  ;;  %s104_s6 = smov [#allocation2]   ;;  %s56_s10 = scalar_lea.hbm %s140_s0, 256 }
   0x2   :  { %s14_s7 = sshll.u32 %s104_s6, 4  ;;  %p57_p0 = scmp.ne.s32.totalorder %s140_s0, %s56_s10  ;;  %s15_s7 = int_to_ptr.vmem [resolvable:$true] %s14_s7 }
   0x3   :  { %p60_p1 = scmp.lt.u32.totalorder %s56_s10, %s140_s0 }
   0x5   :  { %p62_p2 = pnand %p60_p1, %p57_p0 }
   0x7   :  { %65 = shalt.err (!%p62_p2)
}
   0x8   :  { %s66_s15 = scalar_lea.vmem %s15_s7, 256  ;;  %p71_p4 = scmp.lt.s32.totalorder %s15_s7, %s15_s7 }
   0x9   :  { %p67_p3 = scmp.ne.s32.totalorder %s15_s7, %s66_s15  ;;  %p72_p5 = scmp.lt.s32.totalorder %s66_s15, %s66_s15 }
   0xb   :  { %p73_p6 = por %p72_p5, %p71_p4 }
   0xd   :  { %p74_p7 = pnand %p73_p6, %p67_p3 }
   0xf   :  { %77 = shalt.err (!%p74_p7)
}
  0x10   :  { %17 = dma.hbm_to_vmem [thread:$0]  %s140_s0, 256, %s15_s7, [#allocation3]  }
  0x11   :  { %100 = dma.done.wait [#allocation3], 256  }
  0x12   :  { %101 = vsyncadd [#allocation3], 4294967040  ;;  %v21_v0 = vld [vmem:[#allocation2] sm:$0xff]  ;;  %v22_v1 = vld [vmem:[#allocation2 + $0x8] sm:$0xff]  ;;  %s105_s18 = smov [#allocation5]  }
  0x13   :  { %v23_v2 = vmul.f32 0.5, %v21_v0  ;;  %v24_v3 = vmul.f32 0.5, %v22_v1  ;;  %s41_s19 = sshll.u32 %s105_s18, 4  ;;  %s42_s19 = int_to_ptr.vmem [resolvable:$true] %s41_s19 }
  0x14   :  { %s78_s0 = scalar_lea.vmem %s42_s19, 256  ;;  %p83_p9 = scmp.lt.s32.totalorder %s42_s19, %s42_s19 }
  0x15   :  { %52 = vtanh.f32 %v23_v2  ;;  %p79_p8 = scmp.ne.s32.totalorder %s42_s19, %s78_s0  ;;  %p84_p10 = scmp.lt.s32.totalorder %s78_s0, %s78_s0 }
  0x16   :  { %54 = vtanh.f32 %v24_v3 }
  0x17   :  { %p85_p11 = por %p84_p10, %p83_p9 }
  0x19   :  { %p86_p12 = pnand %p85_p11, %p79_p8 }
  0x1f   :  { %v53_v4 = vpop.eup %52 }
  0x20   :  { %v55_v5 = vpop.eup %54  ;;  %v27_v6 = vadd.f32 1.0, %v53_v4 }
  0x21   :  { %v28_v7 = vadd.f32 1.0, %v55_v5 }
  0x22   :  { %v29_v8 = vmul.f32 0.5, %v27_v6 }
  0x23   :  { %v30_v9 = vmul.f32 0.5, %v28_v7 }
  0x24   :  { %v31_v10 = vmul.f32 %v29_v8, %v21_v0 }
  0x25   :  { %v32_v11 = vmul.f32 %v30_v9, %v22_v1 }
  0x26   :  { %33 = vst [vmem:[#allocation5] sm:$0xff] %v31_v10 }
  0x27   :  { %34 = vst [vmem:[#allocation5 + $0x8] sm:$0xff] %v32_v11 }
  0x28   :  { %89 = shalt.err (!%p86_p12)
}
  0x29   :  { %s90_s22 = scalar_lea.hbm %s141_s1, 256 }
  0x2a   :  { %p91_p13 = scmp.ne.s32.totalorder %s141_s1, %s90_s22  ;;  %p94_p0 = scmp.lt.u32.totalorder %s90_s22, %s141_s1 }
  0x2c   :  { %p96_p1 = pnand %p94_p0, %p91_p13 }
  0x2e   :  { %99 = shalt.err (!%p96_p1)
}
  0x2f   :  { %44 = dma.vmem_to_hbm [thread:$0]  %s42_s19, 256, %s141_s1, [#allocation4]  }
  0x30   :  { %102 = dma.done.wait [#allocation4], 256  }
  0x31   :  { %103 = vsyncadd [#allocation4], 4294967040 }
  0x32   :  { %48 = vsyncpa [#allocation3], 1 }
  0x33   :  { %49 = vsyncpa [#allocation4], 1 }

</bundles_post_ra>
